<compile_context>
chip_gen: v5e
topology: v5e:2x2
jax: 0.10.0
libtpu: 0.0.40
codegen_flags: <defaults>
</compile_context>

<pallas_src>
import jax
import jax.numpy as jnp
from jax.experimental import pallas as pl
from jax.experimental.pallas import tpu as pltpu


IMAGE_SIZE = 16
FLAT_SIZE = IMAGE_SIZE * IMAGE_SIZE   # 256
HIDDEN = 64
ENCODING_DIM = 32

# Batch-tile sizing. Tiles must be a multiple of 16 rows (bf16 sublane packing).
TILE_B_MAX = 1024       # upper bound; x+out tiles at bf16 ≈ 1 MiB (fits any VMEM)
TILE_B_MIN = 128        # amortize ~0.35us per-grid-step overhead
MIN_GRID_STEPS = 8      # keep >=4 steps per TensorCore on v7x megacore

ACT_DTYPE = jnp.bfloat16     # activation / weight HBM + MXU-input dtype
BIAS_DTYPE = jnp.float32     # epilogue (bias/ReLU/sigmoid) stays f32 in-register


def _autoencoder_kernel(x_ref,
                        w1_ref, b1_ref,
                        w2_ref, b2_ref,
                        w3_ref, b3_ref,
                        w4_ref, b4_ref,
                        o_ref):
    """Fused encoder+decoder MLP for one batch tile.

    x_ref: [tile_b, 256] bf16   w_i: [in_i, out_i] bf16   b_i: [1, out_i] f32
    o_ref: [tile_b, 256] bf16
    """
    x = x_ref[...]

    # encoder: Linear(256,64) + ReLU   (MXU bf16 -> f32 accum, epilogue in f32)
    h = jnp.dot(x, w1_ref[...], preferred_element_type=jnp.float32) + b1_ref[...]
    h = jnp.maximum(h, 0.0).astype(ACT_DTYPE)

    # encoder: Linear(64,32) + ReLU  -> latent code
    h = jnp.dot(h, w2_ref[...], preferred_element_type=jnp.float32) + b2_ref[...]
    h = jnp.maximum(h, 0.0).astype(ACT_DTYPE)

    # decoder: Linear(32,64) + ReLU
    h = jnp.dot(h, w3_ref[...], preferred_element_type=jnp.float32) + b3_ref[...]
    h = jnp.maximum(h, 0.0).astype(ACT_DTYPE)

    # decoder: Linear(64,256) + Sigmoid
    h = jnp.dot(h, w4_ref[...], preferred_element_type=jnp.float32) + b4_ref[...]
    # sigmoid(x) == 0.5 * tanh(0.5 * x) + 0.5  -> single EUP push per vreg.
    o_ref[...] = (0.5 * jnp.tanh(0.5 * h) + 0.5).astype(o_ref.dtype)


def _round_up(x, m):
    return (x + m - 1) // m * m


def _pick_tile_b(b):
    """Batch tile: large for big B, but keep >= MIN_GRID_STEPS grid steps."""
    tile_b = _round_up(max(pl.cdiv(b, MIN_GRID_STEPS), 1), 16)
    tile_b = min(tile_b, TILE_B_MAX)
    # Floor at TILE_B_MIN (but never larger than the whole padded batch).
    tile_b = max(tile_b, min(TILE_B_MIN, _round_up(b, 16)))
    return tile_b


@jax.jit
def configurable_autoencoder_forward(x_nchw, params):
    """x_nchw: [B, 1, H, W] -> [B, 1, H, W] bfloat16 reconstruction."""
    b = x_nchw.shape[0]
    # nn.Flatten (row-major); bf16 HBM I/O (activations dominate traffic).
    x_flat = x_nchw.reshape(b, -1).astype(ACT_DTYPE)

    (w1, b1), (w2, b2), (w3, b3), (w4, b4) = params

    tile_b = _pick_tile_b(b)
    grid = (pl.cdiv(b, tile_b),)   # partial last block handled by Pallas masking

    # Weights/biases: full-array blocks, constant block index -> fetched once,
    # VMEM-resident across grid steps.
    # TODO(synk): pipeline_mode=pl.Buffered(1) on these specs would trim ~90 KiB
    # of redundant double-buffer VMEM on v7x; total use here is ~2 MiB so the
    # default buffering is kept for portability.
    def resident(arr):
        return pl.BlockSpec(arr.shape, lambda i: (0, 0))

    flops = 2 * b * (FLAT_SIZE * HIDDEN + HIDDEN * ENCODING_DIM
                     + ENCODING_DIM * HIDDEN + HIDDEN * FLAT_SIZE)
    weight_bytes = sum(int(w.size * w.dtype.itemsize + bb.size * bb.dtype.itemsize)
                       for (w, bb) in params)
    act_bytes = 2 * b * FLAT_SIZE * jnp.dtype(ACT_DTYPE).itemsize   # read x + write out

    out_flat = pl.pallas_call(
        _autoencoder_kernel,
        out_shape=jax.ShapeDtypeStruct((b, FLAT_SIZE), ACT_DTYPE),
        grid=grid,
        in_specs=[
            pl.BlockSpec((tile_b, FLAT_SIZE), lambda i: (i, 0)),   # x: batch-tiled
            resident(w1), resident(b1),
            resident(w2), resident(b2),
            resident(w3), resident(b3),
            resident(w4), resident(b4),
        ],
        out_specs=pl.BlockSpec((tile_b, FLAT_SIZE), lambda i: (i, 0)),
        compiler_params=pltpu.CompilerParams(
            dimension_semantics=("parallel",),   # batch axis -> both TCs on v7x
        ),
        cost_estimate=pl.CostEstimate(
            flops=flops,
            transcendentals=b * FLAT_SIZE,       # one tanh per output element
            bytes_accessed=act_bytes + weight_bytes,
        ),
    )(x_flat, w1, b1, w2, b2, w3, b3, w4, b4)

    # nn.Unflatten(1, (1, 16, 16))
    return out_flat.reshape(b, 1, IMAGE_SIZE, IMAGE_SIZE)


def init_params(key):
    """Deterministic init mimicking nn.Linear's U(-1/sqrt(fan_in), +1/sqrt(fan_in)).

    Weights stored as [in, out] (transpose of torch's [out, in]) so the kernel
    computes y = x @ W + b; weights in bf16 (MXU inputs), biases f32 [1, out].
    """
    dims = [(FLAT_SIZE, HIDDEN), (HIDDEN, ENCODING_DIM),
            (ENCODING_DIM, HIDDEN), (HIDDEN, FLAT_SIZE)]
    params = []
    for (fan_in, fan_out) in dims:
        key, kw, kb = jax.random.split(key, 3)
        bound = 1.0 / jnp.sqrt(fan_in)
        w = jax.random.uniform(kw, (fan_in, fan_out), jnp.float32, -bound, bound)
        bias = jax.random.uniform(kb, (1, fan_out), jnp.float32, -bound, bound)
        params.append((w.astype(ACT_DTYPE), bias.astype(BIAS_DTYPE)))
    return params


def _reference_forward(x_nchw, params):
    """Pure-JAX f32 reference of the same forward pass (for a sanity check)."""
    b = x_nchw.shape[0]
    h = x_nchw.reshape(b, -1).astype(jnp.float32)
    (w1, b1), (w2, b2), (w3, b3), (w4, b4) = params
    h = jnp.maximum(h @ w1.astype(jnp.float32) + b1.astype(jnp.float32), 0.0)
    h = jnp.maximum(h @ w2.astype(jnp.float32) + b2.astype(jnp.float32), 0.0)
    h = jnp.maximum(h @ w3.astype(jnp.float32) + b3.astype(jnp.float32), 0.0)
    h = jax.nn.sigmoid(h @ w4.astype(jnp.float32) + b4.astype(jnp.float32))
    return h.reshape(b, 1, IMAGE_SIZE, IMAGE_SIZE)


if __name__ == "__main__":
    key = jax.random.PRNGKey(0)
    key, kx_small, kx_big = jax.random.split(key, 3)
    params = init_params(key)

    # Small batch (module-typical input; single partial block, masked-store path).
    x_small = jax.random.uniform(kx_small, (2, 1, IMAGE_SIZE, IMAGE_SIZE), jnp.float32)
    out_small = jax.block_until_ready(configurable_autoencoder_forward(x_small, params))
    ref_small = _reference_forward(x_small, params)
    assert out_small.shape == (2, 1, IMAGE_SIZE, IMAGE_SIZE)
    assert jnp.allclose(out_small.astype(jnp.float32), ref_small, atol=2e-2)

    # Larger, non-multiple batch: multiple grid steps + partial last block
    # (B=300 -> tile_b=128, grid=(3,), last block 44 valid rows).
    x_big = jax.random.uniform(kx_big, (300, 1, IMAGE_SIZE, IMAGE_SIZE), jnp.float32)
    out_big = jax.block_until_ready(configurable_autoencoder_forward(x_big, params))
    ref_big = _reference_forward(x_big, params)
    assert out_big.shape == (300, 1, IMAGE_SIZE, IMAGE_SIZE)
    assert jnp.allclose(out_big.astype(jnp.float32), ref_big, atol=2e-2)

    print("KERNEL_OK")
</pallas_src>

<mosaic_0001>
module attributes {stable_mosaic.version = 11 : i64} {
  func.func @_autoencoder_kernel(%arg0: i32, %arg1: memref<16x256xbf16, #tpu.memory_space<vmem>>, %arg2: memref<256x64xbf16, #tpu.memory_space<vmem>>, %arg3: memref<1x64xf32, #tpu.memory_space<vmem>>, %arg4: memref<64x32xbf16, #tpu.memory_space<vmem>>, %arg5: memref<1x32xf32, #tpu.memory_space<vmem>>, %arg6: memref<32x64xbf16, #tpu.memory_space<vmem>>, %arg7: memref<1x64xf32, #tpu.memory_space<vmem>>, %arg8: memref<64x256xbf16, #tpu.memory_space<vmem>>, %arg9: memref<1x256xf32, #tpu.memory_space<vmem>>, %arg10: memref<16x256xbf16, #tpu.memory_space<vmem>>) attributes {dimension_semantics = [#tpu.dimension_semantics<parallel>], iteration_bounds = array<i64: 1>, scalar_prefetch = 0 : i64, scratch_operands = 0 : i64, tpu.core_type = #tpu.core_type<tc>, window_params = [{transform_indices = @transform_0, window_bounds = array<i64: 16, 256>}, {pipeline_mode = #tpu.pipeline_mode<synchronous>, transform_indices = @transform_1, window_bounds = array<i64: 256, 64>}, {pipeline_mode = #tpu.pipeline_mode<synchronous>, transform_indices = @transform_2, window_bounds = array<i64: 1, 64>}, {pipeline_mode = #tpu.pipeline_mode<synchronous>, transform_indices = @transform_3, window_bounds = array<i64: 64, 32>}, {pipeline_mode = #tpu.pipeline_mode<synchronous>, transform_indices = @transform_4, window_bounds = array<i64: 1, 32>}, {pipeline_mode = #tpu.pipeline_mode<synchronous>, transform_indices = @transform_5, window_bounds = array<i64: 32, 64>}, {pipeline_mode = #tpu.pipeline_mode<synchronous>, transform_indices = @transform_6, window_bounds = array<i64: 1, 64>}, {pipeline_mode = #tpu.pipeline_mode<synchronous>, transform_indices = @transform_7, window_bounds = array<i64: 64, 256>}, {pipeline_mode = #tpu.pipeline_mode<synchronous>, transform_indices = @transform_8, window_bounds = array<i64: 1, 256>}, {transform_indices = @transform_9, window_bounds = array<i64: 16, 256>}]} {
    %c0 = arith.constant 0 : index
    %c0_0 = arith.constant 0 : index
    %0 = vector.load %arg1[%c0, %c0_0] : memref<16x256xbf16, #tpu.memory_space<vmem>>, vector<16x256xbf16>
    %c0_1 = arith.constant 0 : index
    %c0_2 = arith.constant 0 : index
    %1 = vector.load %arg2[%c0_1, %c0_2] : memref<256x64xbf16, #tpu.memory_space<vmem>>, vector<256x64xbf16>
    %cst = arith.constant dense<0.000000e+00> : vector<16x64xf32>
    %2 = tpu.matmul %0, %1, %cst {dimension_numbers = #tpu.dot_dimension_numbers<[1], [0], [0], [1], [0, 0, 1, 1], [], []>} : vector<16x256xbf16>, vector<256x64xbf16>, vector<16x64xf32> -> vector<16x64xf32>
    %c0_3 = arith.constant 0 : index
    %c0_4 = arith.constant 0 : index
    %3 = vector.load %arg3[%c0_3, %c0_4] : memref<1x64xf32, #tpu.memory_space<vmem>>, vector<1x64xf32>
    %4 = vector.broadcast %3 : vector<1x64xf32> to vector<16x64xf32>
    %5 = arith.addf %2, %4 : vector<16x64xf32>
    %cst_5 = arith.constant 0.000000e+00 : f32
    %6 = vector.broadcast %cst_5 : f32 to vector<16x64xf32>
    %7 = arith.maximumf %5, %6 : vector<16x64xf32>
    %8 = arith.truncf %7 : vector<16x64xf32> to vector<16x64xbf16>
    %c0_6 = arith.constant 0 : index
    %c0_7 = arith.constant 0 : index
    %9 = vector.load %arg4[%c0_6, %c0_7] : memref<64x32xbf16, #tpu.memory_space<vmem>>, vector<64x32xbf16>
    %cst_8 = arith.constant dense<0.000000e+00> : vector<16x32xf32>
    %10 = tpu.matmul %8, %9, %cst_8 {dimension_numbers = #tpu.dot_dimension_numbers<[1], [0], [0], [1], [0, 0, 1, 1], [], []>} : vector<16x64xbf16>, vector<64x32xbf16>, vector<16x32xf32> -> vector<16x32xf32>
    %c0_9 = arith.constant 0 : index
    %c0_10 = arith.constant 0 : index
    %11 = vector.load %arg5[%c0_9, %c0_10] : memref<1x32xf32, #tpu.memory_space<vmem>>, vector<1x32xf32>
    %12 = vector.broadcast %11 : vector<1x32xf32> to vector<16x32xf32>
    %13 = arith.addf %10, %12 : vector<16x32xf32>
    %cst_11 = arith.constant 0.000000e+00 : f32
    %14 = vector.broadcast %cst_11 : f32 to vector<16x32xf32>
    %15 = arith.maximumf %13, %14 : vector<16x32xf32>
    %16 = arith.truncf %15 : vector<16x32xf32> to vector<16x32xbf16>
    %c0_12 = arith.constant 0 : index
    %c0_13 = arith.constant 0 : index
    %17 = vector.load %arg6[%c0_12, %c0_13] : memref<32x64xbf16, #tpu.memory_space<vmem>>, vector<32x64xbf16>
    %cst_14 = arith.constant dense<0.000000e+00> : vector<16x64xf32>
    %18 = tpu.matmul %16, %17, %cst_14 {dimension_numbers = #tpu.dot_dimension_numbers<[1], [0], [0], [1], [0, 0, 1, 1], [], []>} : vector<16x32xbf16>, vector<32x64xbf16>, vector<16x64xf32> -> vector<16x64xf32>
    %c0_15 = arith.constant 0 : index
    %c0_16 = arith.constant 0 : index
    %19 = vector.load %arg7[%c0_15, %c0_16] : memref<1x64xf32, #tpu.memory_space<vmem>>, vector<1x64xf32>
    %20 = vector.broadcast %19 : vector<1x64xf32> to vector<16x64xf32>
    %21 = arith.addf %18, %20 : vector<16x64xf32>
    %cst_17 = arith.constant 0.000000e+00 : f32
    %22 = vector.broadcast %cst_17 : f32 to vector<16x64xf32>
    %23 = arith.maximumf %21, %22 : vector<16x64xf32>
    %24 = arith.truncf %23 : vector<16x64xf32> to vector<16x64xbf16>
    %c0_18 = arith.constant 0 : index
    %c0_19 = arith.constant 0 : index
    %25 = vector.load %arg8[%c0_18, %c0_19] : memref<64x256xbf16, #tpu.memory_space<vmem>>, vector<64x256xbf16>
    %cst_20 = arith.constant dense<0.000000e+00> : vector<16x256xf32>
    %26 = tpu.matmul %24, %25, %cst_20 {dimension_numbers = #tpu.dot_dimension_numbers<[1], [0], [0], [1], [0, 0, 1, 1], [], []>} : vector<16x64xbf16>, vector<64x256xbf16>, vector<16x256xf32> -> vector<16x256xf32>
    %c0_21 = arith.constant 0 : index
    %c0_22 = arith.constant 0 : index
    %27 = vector.load %arg9[%c0_21, %c0_22] : memref<1x256xf32, #tpu.memory_space<vmem>>, vector<1x256xf32>
    %28 = vector.broadcast %27 : vector<1x256xf32> to vector<16x256xf32>
    %29 = arith.addf %26, %28 : vector<16x256xf32>
    %cst_23 = arith.constant 5.000000e-01 : f32
    %30 = vector.broadcast %cst_23 : f32 to vector<16x256xf32>
    %31 = arith.mulf %30, %29 : vector<16x256xf32>
    %32 = math.tanh %31 : vector<16x256xf32>
    %cst_24 = arith.constant 5.000000e-01 : f32
    %33 = vector.broadcast %cst_24 : f32 to vector<16x256xf32>
    %34 = arith.mulf %33, %32 : vector<16x256xf32>
    %cst_25 = arith.constant 5.000000e-01 : f32
    %35 = vector.broadcast %cst_25 : f32 to vector<16x256xf32>
    %36 = arith.addf %34, %35 : vector<16x256xf32>
    %37 = arith.truncf %36 : vector<16x256xf32> to vector<16x256xbf16>
    %c0_26 = arith.constant 0 : index
    %c0_27 = arith.constant 0 : index
    %38 = vector.load %arg10[%c0_26, %c0_27] : memref<16x256xbf16, #tpu.memory_space<vmem>>, vector<16x256xbf16>
    tpu.vector_store %arg10[%c0_26, %c0_27], %37 {strides = array<i32>} : memref<16x256xbf16, #tpu.memory_space<vmem>>, vector<16x256xbf16>,
    return
  }
  func.func @transform_0(%arg0: i32) -> (i32, i32) {
    %c0_i32 = arith.constant 0 : i32
    %c0_i32_0 = arith.constant 0 : i32
    return %arg0, %c0_i32 : i32, i32
  }
  func.func @transform_1(%arg0: i32) -> (i32, i32) {
    %c0_i32 = arith.constant 0 : i32
    %c0_i32_0 = arith.constant 0 : i32
    %c0_i32_1 = arith.constant 0 : i32
    return %c0_i32, %c0_i32_0 : i32, i32
  }
  func.func @transform_2(%arg0: i32) -> (i32, i32) {
    %c0_i32 = arith.constant 0 : i32
    %c0_i32_0 = arith.constant 0 : i32
    %c0_i32_1 = arith.constant 0 : i32
    return %c0_i32, %c0_i32_0 : i32, i32
  }
  func.func @transform_3(%arg0: i32) -> (i32, i32) {
    %c0_i32 = arith.constant 0 : i32
    %c0_i32_0 = arith.constant 0 : i32
    %c0_i32_1 = arith.constant 0 : i32
    return %c0_i32, %c0_i32_0 : i32, i32
  }
  func.func @transform_4(%arg0: i32) -> (i32, i32) {
    %c0_i32 = arith.constant 0 : i32
    %c0_i32_0 = arith.constant 0 : i32
    %c0_i32_1 = arith.constant 0 : i32
    return %c0_i32, %c0_i32_0 : i32, i32
  }
  func.func @transform_5(%arg0: i32) -> (i32, i32) {
    %c0_i32 = arith.constant 0 : i32
    %c0_i32_0 = arith.constant 0 : i32
    %c0_i32_1 = arith.constant 0 : i32
    return %c0_i32, %c0_i32_0 : i32, i32
  }
  func.func @transform_6(%arg0: i32) -> (i32, i32) {
    %c0_i32 = arith.constant 0 : i32
    %c0_i32_0 = arith.constant 0 : i32
    %c0_i32_1 = arith.constant 0 : i32
    return %c0_i32, %c0_i32_0 : i32, i32
  }
  func.func @transform_7(%arg0: i32) -> (i32, i32) {
    %c0_i32 = arith.constant 0 : i32
    %c0_i32_0 = arith.constant 0 : i32
    %c0_i32_1 = arith.constant 0 : i32
    return %c0_i32, %c0_i32_0 : i32, i32
  }
  func.func @transform_8(%arg0: i32) -> (i32, i32) {
    %c0_i32 = arith.constant 0 : i32
    %c0_i32_0 = arith.constant 0 : i32
    %c0_i32_1 = arith.constant 0 : i32
    return %c0_i32, %c0_i32_0 : i32, i32
  }
  func.func @transform_9(%arg0: i32) -> (i32, i32) {
    %c0_i32 = arith.constant 0 : i32
    %c0_i32_0 = arith.constant 0 : i32
    return %arg0, %c0_i32 : i32, i32
  }
}

</mosaic_0001>

<bundles_post_ra>
// kernel: configurable_autoencoder_forward.1
= control target key start
LH: loop header
LB: loop body
LE: loop exit
PB: predicated region body
PF: predicated region fallthrough
CT: control target
= control target key end

     0   :  { %vm267_vm0 = vcmask 523264   ;;  %vm308_vm1 = vcmask 261120   ;;  %vm436_vm2 = vcmask 1040384   ;;  %s892_s0 = inlined_call_operand.vmem [shape: bf16[2,256], index: 0, kind: input, shape index: {}]   ;;  %s893_s1 = inlined_call_operand.vmem [shape: bf16[256,64], index: 1, kind: input, shape index: {}]   ;;  %s894_s2 = inlined_call_operand.vmem [shape: f32[1,64], index: 2, kind: input, shape index: {}]   ;;  %s895_s3 = inlined_call_operand.vmem [shape: bf16[64,32], index: 3, kind: input, shape index: {}]   ;;  %s896_s4 = inlined_call_operand.vmem [shape: f32[1,32], index: 4, kind: input, shape index: {}]   ;;  %s897_s5 = inlined_call_operand.vmem [shape: bf16[32,64], index: 5, kind: input, shape index: {}]   ;;  %s898_s6 = inlined_call_operand.vmem [shape: f32[1,64], index: 6, kind: input, shape index: {}]   ;;  %s899_s7 = inlined_call_operand.vmem [shape: bf16[64,256], index: 7, kind: input, shape index: {}]   ;;  %s900_s8 = inlined_call_operand.vmem [shape: f32[1,256], index: 8, kind: input, shape index: {}]   ;;  %s901_s9 = inlined_call_operand.vmem [shape: bf16[2,256], index: 9, kind: output, shape index: {}]  }
   0x1   :  { %v652_v0 = vld [vmem:[%s893_s1 + $0x38] sm:$0xff]  ;;  %v651_v2 = vld [vmem:[%s893_s1 + $0x30] sm:$0xff]  ;;  %v33_v4 = vld [vmem:[%s892_s0] sm:$0x3] }
   0x2   :  { %v660_v1 = vld [vmem:[%s893_s1 + $0x78] sm:$0xff]  ;;  %200 = vmatpush.bf16.msra.mxu0 %v652_v0  ;;  %v659_v3 = vld [vmem:[%s893_s1 + $0x70] sm:$0xff]  ;;  %v650_v5 = vld [vmem:[%s893_s1 + $0x28] sm:$0xff]  ;;  %78 = vst [vmem:[#allocation1] ss:$9 sm:$0xff] %v33_v4 }
   0x3   :  { %214 = vmatpush.bf16.msra.mxu1 %v660_v1  ;;  %v658_v6 = vld [vmem:[%s893_s1 + $0x68] sm:$0xff]  ;;  %v34_v7 = vld [vmem:[%s892_s0 + $0x2] sm:$0x3]  ;;  %v35_v8 = vld [vmem:[%s892_s0 + $0x4] sm:$0x3] }
   0x4   :  { %v36_v9 = vld [vmem:[%s892_s0 + $0x6] sm:$0x3]  ;;  %v37_v10 = vld [vmem:[%s892_s0 + $0x8] sm:$0x3]  ;;  %81 = vst [vmem:[#allocation1 + $0x1] ss:$9 sm:$0xff] %v34_v7 }
   0x5   :  { %v649_v11 = vld [vmem:[%s893_s1 + $0x20] sm:$0xff]  ;;  %v38_v13 = vld [vmem:[%s892_s0 + $0xa] sm:$0x3]  ;;  %84 = vst [vmem:[#allocation1 + $0x2] ss:$9 sm:$0xff] %v35_v8  ;;  %v648_v16 = vld [vmem:[%s893_s1 + $0x18] sm:$0xff] }
   0x6   :  { %201 = vmatpush.bf16.msra.mxu0 %v651_v2  ;;  %v657_v12 = vld [vmem:[%s893_s1 + $0x60] sm:$0xff]  ;;  %v39_v14 = vld [vmem:[%s892_s0 + $0xc] sm:$0x3]  ;;  %87 = vst [vmem:[#allocation1 + $0x3] ss:$9 sm:$0xff] %v36_v9  ;;  %v656_v17 = vld [vmem:[%s893_s1 + $0x58] sm:$0xff] }
   0x7   :  { %215 = vmatpush.bf16.msra.mxu1 %v659_v3  ;;  %v40_v15 = vld [vmem:[%s892_s0 + $0xe] sm:$0x3]  ;;  %90 = vst [vmem:[#allocation1 + $0x4] ss:$9 sm:$0xff] %v37_v10  ;;  %v647_v18 = vld [vmem:[%s893_s1 + $0x10] sm:$0xff]  ;;  %v645_v22 = vld [vmem:[%s893_s1] sm:$0xff] }
   0x8   :  { %93 = vst [vmem:[#allocation1 + $0x5] ss:$9 sm:$0xff] %v38_v13  ;;  %v655_v19 = vld [vmem:[%s893_s1 + $0x50] sm:$0xff]  ;;  %v646_v20 = vld [vmem:[%s893_s1 + $0x8] sm:$0xff]  ;;  %v653_v23 = vld [vmem:[%s893_s1 + $0x40] sm:$0xff] }
   0x9   :  { %96 = vst [vmem:[#allocation1 + $0x6] ss:$9 sm:$0xff] %v39_v14  ;;  %v654_v21 = vld [vmem:[%s893_s1 + $0x48] sm:$0xff]  ;;  %v664_v26 = vld [vmem:[%s895_s3 + $0x18] sm:$0xff]  ;;  %v663_v27 = vld [vmem:[%s895_s3 + $0x10] sm:$0xff] }
   0xa   :  { %202 = vmatpush.bf16.msra.mxu0 %v650_v5  ;;  %99 = vst [vmem:[#allocation1 + $0x7] ss:$9 sm:$0xff] %v40_v15  ;;  %275 = vmatpush.bf16.msra.mxu2 %v664_v26  ;;  %v662_v28 = vld [vmem:[%s895_s3 + $0x8] sm:$0xff]  ;;  %v661_v29 = vld [vmem:[%s895_s3] sm:$0xff]  ;;  %v637_v44 = vld [vmem:[%s899_s7 + $0x30] sm:$0xf] }
   0xb   :  { %216 = vmatpush.bf16.msra.mxu1 %v658_v6  ;;  %v675_v32 = vld [vmem:[%s894_s2] ss:$0 sm:$0xff]  ;;  %v666_v42 = vld [vmem:[%s897_s5 + $0x8] sm:$0xff]  ;;  %v674_v45 = vld [vmem:[%s899_s7 + $0x34] sm:$0xf0] }
   0xc   :  { %318 = vmatpush.bf16.msra.mxu3 %v666_v42  ;;  %v665_v43 = vld [vmem:[%s897_s5] sm:$0xff]  ;;  %v673_v46 = vld [vmem:[%s899_s7 + $0x34] sm:$0xf]  ;;  %v638_v47 = vor.u32 %v674_v45, %v637_v44  ;;  %v639_v48 = vld [vmem:[%s899_s7 + $0x38] sm:$0xf0] }
   0xd   :  { %v642_v49 = vor.u32 %v673_v46, %v639_v48  ;;  %v676_v51 = vld [vmem:[%s896_s4] ss:$0 sm:$0xff]  ;;  %v672_v59 = vld [vmem:[%s899_s7 + $0x24] sm:$0xf0]  ;;  %v671_v60 = vld [vmem:[%s899_s7 + $0x24] sm:$0xf] }
   0xe   :  { %203 = vmatpush.bf16.msra.mxu0 %v649_v11  ;;  %276 = vmatpush.bf16.msra.mxu2 %v663_v27  ;;  %v629_v58 = vld [vmem:[%s899_s7 + $0x20] sm:$0xf]  ;;  %v631_v62 = vld [vmem:[%s899_s7 + $0x28] sm:$0xf0]  ;;  %v621_v0 = vld [vmem:[%s899_s7 + $0x10] sm:$0xf] }
   0xf   :  { %217 = vmatpush.bf16.msra.mxu1 %v657_v12  ;;  %v630_v61 = vor.u32 %v672_v59, %v629_v58  ;;  %v634_v63 = vor.u32 %v671_v60, %v631_v62  ;;  %v670_v1 = vld [vmem:[%s899_s7 + $0x14] sm:$0xf0]  ;;  %v669_v2 = vld [vmem:[%s899_s7 + $0x14] sm:$0xf]  ;;  %v623_v4 = vld [vmem:[%s899_s7 + $0x18] sm:$0xf0] }
  0x10   :  { %319 = vmatpush.bf16.msra.mxu3 %v665_v43  ;;  %v622_v3 = vor.u32 %v670_v1, %v621_v0  ;;  %v626_v5 = vor.u32 %v669_v2, %v623_v4  ;;  %v613_v6 = vld [vmem:[%s899_s7] sm:$0xf]  ;;  %v668_v7 = vld [vmem:[%s899_s7 + $0x4] sm:$0xf0]  ;;  %v667_v8 = vld [vmem:[%s899_s7 + $0x4] sm:$0xf] }
  0x11   :  { %v100_v24 = vld [vmem:[#allocation1] sm:$0xff]  ;;  %v101_v25 = vld [vmem:[#allocation1 + $0x9] sm:$0xff]  ;;  %v614_v9 = vor.u32 %v668_v7, %v613_v6 }
  0x12   :  { %204 = vmatpush.bf16.msra.mxu0 %v648_v16  ;;  %277 = vmatpush.bf16.msra.mxu2 %v662_v28  ;;  %v615_v10 = vld [vmem:[%s899_s7 + $0x8] sm:$0xf0]  ;;  %v677_v13 = vld [vmem:[%s898_s6] ss:$0 sm:$0xff] }
  0x13   :  { %218 = vmatpush.bf16.msra.mxu1 %v656_v17  ;;  %v618_v11 = vor.u32 %v667_v8, %v615_v10 }
  0x14   :  { %390 = vmatpush.bf16.msrb.mxu3 %v638_v47 }
  0x16   :  { %205 = vmatpush.bf16.msra.mxu0 %v647_v18  ;;  %278 = vmatpush.bf16.msra.mxu2 %v661_v29 }
  0x17   :  { %219 = vmatpush.bf16.msra.mxu1 %v655_v19 }
  0x18   :  { %391 = vmatpush.bf16.msrb.mxu3 %v630_v61 }
  0x1a   :  { %206 = vmatpush.bf16.msra.mxu0 %v646_v20  ;;  %404 = vmatpush.bf16.msrb.mxu2 %v642_v49  ;;  %v337_v20 = vld [vmem:[%s900_s8] sm:$0x3] }
  0x1b   :  { %220 = vmatpush.bf16.msra.mxu1 %v654_v21  ;;  %v339_v21 = vperm.slane %v337_v20, 0 }
  0x1c   :  { %392 = vmatpush.bf16.msrb.mxu3 %v622_v3 }
  0x1e   :  { %207 = vmatpush.bf16.msra.mxu0 %v645_v22  ;;  %405 = vmatpush.bf16.msrb.mxu2 %v634_v63  ;;  %v340_v22 = vperm.slane %v337_v20, 1 }
  0x1f   :  { %221 = vmatpush.bf16.msra.mxu1 %v653_v23 }
  0x20   :  { %393 = vmatpush.bf16.msrb.mxu3 %v614_v9 }
  0x21   :  { %208 = vmatmul.bf16.vlgmr.msra.gmra.mxu0 %v100_v24 }
  0x22   :  { %222 = vmatmul.bf16.vlgmr.msra.gmra.mxu1 %v101_v25  ;;  %406 = vmatpush.bf16.msrb.mxu2 %v626_v5 }
  0x26   :  { %407 = vmatpush.bf16.msrb.mxu2 %v618_v11 }
  0x9e   :  { %v209_v30 = vpop.f32.mrf.mxu0 }
  0x9f   :  { %v223_v31 = vpop.f32.mrf.mxu1  ;;  %v210_v33 = vadd.f32 %v675_v32, %v209_v30 }
  0xa1   :  { %v224_v35 = vadd.f32 %v223_v31, %v210_v33 }
  0xa3   :  { %v228_v39 = vmax.f32 %v224_v35, 0.0 }
  0xa6   :  { %v211_v34 = vpop.f32.mrf.mxu0 }
  0xa7   :  { %v212_v36 = vadd.f32 %v675_v32, %v211_v34  ;;  %v225_v37 = vpop.f32.mrf.mxu1 }
  0xa9   :  { %v226_v38 = vadd.f32 %v225_v37, %v212_v36 }
  0xab   :  { %v229_v40 = vmax.f32 %v226_v38, 0.0 }
  0xad   :  { %v230_v41 = vpack.c.bf16 %v229_v40, %v228_v39 }
  0xaf   :  { %601 = vmatmul.msk.bf16.vlgmr.msra.gmra.mxu2 %vm267_vm0, %v230_v41 }
 0x132   :  { %v280_v50 = vpop.f32.mrf.mxu2 }
 0x133   :  { %v281_v52 = vadd.f32 %v676_v51, %v280_v50 }
 0x135   :  { %v285_v55 = vmax.f32 %v281_v52, 0.0 }
 0x13a   :  { %v282_v53 = vpop.f32.mrf.mxu2 }
 0x13b   :  { %v283_v54 = vadd.f32 %v676_v51, %v282_v53 }
 0x13d   :  { %v286_v56 = vmax.f32 %v283_v54, 0.0 }
 0x13f   :  { %v287_v57 = vpack.c.bf16 %v286_v56, %v285_v55 }
 0x141   :  { %610 = vmatmul.msk.bf16.vlgmr.msra.gmra.mxu3 %vm308_vm1, %v287_v57 }
 0x1c4   :  { %v321_v12 = vpop.f32.mrf.mxu3 }
 0x1c5   :  { %v322_v14 = vadd.f32 %v677_v13, %v321_v12 }
 0x1c7   :  { %v326_v17 = vmax.f32 %v322_v14, 0.0 }
 0x1cc   :  { %v323_v15 = vpop.f32.mrf.mxu3 }
 0x1cd   :  { %v324_v16 = vadd.f32 %v677_v13, %v323_v15 }
 0x1cf   :  { %v327_v18 = vmax.f32 %v324_v16, 0.0 }
 0x1d1   :  { %v328_v19 = vpack.c.bf16 %v327_v18, %v326_v17 }
 0x1d3   :  { %643 = vmatmul.msk.bf16.vlgmr.msrb.gmra.mxu3 %vm267_vm0, %v328_v19  ;;  %644 = vmatmul.msk.bf16.vlgmr.msrb.gmra.mxu2 %vm267_vm0, %v328_v19 }
 0x256   :  { %v395_v23 = vpop.f32.mrf.mxu3  ;;  %v409_v24 = vpop.f32.mrf.mxu2 }
 0x257   :  { %v396_v25 = vadd.f32 %v395_v23, %v339_v21  ;;  %v410_v26 = vadd.f32 %v409_v24, %v340_v22 }
 0x259   :  { %v414_v27 = vmul.f32 0.5, %v396_v25  ;;  %v415_v28 = vmul.f32 0.5, %v410_v26 }
 0x25b   :  { %678 = vtanh.f32 %v414_v27 }
 0x25c   :  { %680 = vtanh.f32 %v415_v28 }
 0x25e   :  { %v397_v29 = vpop.f32.mrf.mxu3  ;;  %v411_v30 = vpop.f32.mrf.mxu2 }
 0x25f   :  { %v398_v31 = vadd.f32 %v397_v29, %v339_v21  ;;  %v412_v32 = vadd.f32 %v411_v30, %v340_v22 }
 0x261   :  { %v679_v33 = vpop.eup %678  ;;  %v416_v34 = vmul.f32 0.5, %v398_v31  ;;  %v417_v35 = vmul.f32 0.5, %v412_v32 }
 0x262   :  { %v681_v36 = vpop.eup %680  ;;  %v422_v37 = vmul.f32 0.5, %v679_v33 }
 0x263   :  { %v423_v38 = vmul.f32 0.5, %v681_v36  ;;  %682 = vtanh.f32 %v416_v34 }
 0x264   :  { %v426_v39 = vadd.f32 0.5, %v422_v37  ;;  %684 = vtanh.f32 %v417_v35 }
 0x265   :  { %v427_v40 = vadd.f32 0.5, %v423_v38 }
 0x267   :  { %v430_v41 = vpack.c.bf16 %v427_v40, %v426_v39 }
 0x269   :  { %v683_v42 = vpop.eup %682  ;;  %v434_v43 = vrot.slane %v430_v41, 3 }
 0x26a   :  { %v685_v44 = vpop.eup %684 }
 0x26b   :  { %v439_v45 = vsel %vm436_vm2, %v430_v41, %v434_v43 }
 0x26c   :  { %472 = vst [vmem:[#allocation2] sm:$0x3] %v439_v45 }
 0x273   :  { %v498_v46 = vld [vmem:[#allocation2] sm:$0x3] }
 0x274   :  { %499 = vst [vmem:[%s901_s9] sm:$0x3] %v498_v46 }

</bundles_post_ra>
